<compile_context>
chip_gen: v6e
topology: v6e:2x2x1
jax: 0.10.0
libtpu: 0.0.40
codegen_flags: <defaults>
</compile_context>

<pallas_src>
import functools

import jax
import jax.numpy as jnp
from jax.experimental import pallas as pl
from jax.experimental.pallas import tpu as pltpu

_LANE = 128
_MIB = 1024 * 1024


def _cdiv(a, b):
    return (a + b - 1) // b


def _round_up(x, m):
    return _cdiv(x, m) * m


def _tpu_vmem_capacity_bytes():
    """Physical VMEM of the current chip; conservative fallback = 64 MiB (v7x)."""
    try:
        return int(pltpu.get_tpu_info().vmem_capacity_bytes)
    except Exception:
        return 64 * _MIB


def _lane_dense_shape(n, f):
    """For a layout-agnostic elementwise op, find a reshape of (n, f) whose last
    dim is a multiple of 128 (unmasked vst).  Returns None if already lane-dense
    or no clean reshape exists (would require padding)."""
    total = n * f
    if f % _LANE == 0:
        return None
    if total % _LANE != 0:
        return None
    cols = _LANE
    for mult in (32, 16, 8, 4, 2, 1):       # prefer a wider lane-dense slab
        c = _LANE * mult
        if total % c == 0:
            cols = c
            break
    return total // cols, cols


def _choose_tiles(n, f, itemsize, budget_bytes, num_cores):
    """Pick (tile_n, tile_f) so 2 x (in + other + out + lbda) blocks fit budget."""
    sub = max(8, 32 // itemsize)          # sublane granule: f32->8, bf16->16, int8->32
    half = budget_bytes // 2              # per buffer of the double-buffered pipeline
    lbda_row_bytes = _LANE * 4            # (tile_n, 1) f32 lbda block lane-pads to 128

    # Feature tile: full F if a minimal (sub, F) block set fits, else the
    # largest lane-dense multiple of 128 that does (keeps stores unmasked).
    max_full_f = (half // sub - lbda_row_bytes) // (3 * itemsize)
    if f <= max_full_f:
        tile_f = f
    else:
        tile_f = max(_LANE, (max_full_f // _LANE) * _LANE)

    # Row tile: fill the budget.
    tile_n = half // (3 * tile_f * itemsize + lbda_row_bytes)
    tile_n = max(sub, (tile_n // sub) * sub)
    tile_n = min(tile_n, _round_up(n, sub))
    if tile_n >= n:
        tile_n = n

    # Only multi-TensorCore chips (v7x) benefit from splitting / evening out the
    # row-tile count; on 1-TC chips it is just an extra pipeline step boundary.
    if num_cores >= 2 and n > sub:
        gi = _cdiv(n, tile_n)
        if gi < 2:
            tile_n = min(n, _round_up(_cdiv(n, 2), sub))
        elif gi % 2 == 1 and gi <= 8:
            cand = max(sub, _round_up(_cdiv(n, gi + 1), sub))
            if cand < tile_n and _cdiv(n, cand) % 2 == 0:
                tile_n = cand
    return tile_n, tile_f


# --------------------------------------------------------------------------- #
# Kernels (compute in f32, single cast at the store)
# --------------------------------------------------------------------------- #
def _damping_vec_kernel(lbda_ref, in_ref, other_ref, out_ref):
    # lbda_ref: (tile_n, 1) f32 -> broadcasts over the feature (lane) axis.
    x = in_ref[...].astype(jnp.float32)
    o = other_ref[...].astype(jnp.float32)
    out_ref[...] = (o - lbda_ref[...] * x).astype(out_ref.dtype)


def _damping_const_kernel(lbda, in_ref, other_ref, out_ref):
    # lbda: python float closed over as a compile-time constant.
    x = in_ref[...].astype(jnp.float32)
    o = other_ref[...].astype(jnp.float32)
    out_ref[...] = (o - jnp.float32(lbda) * x).astype(out_ref.dtype)


def _damping_smem_kernel(lbda_ref, in_ref, other_ref, out_ref):
    # lbda_ref: (1, 1) f32 scalar living in SMEM (traced-lbda fallback).
    lbda = lbda_ref[0, 0]
    x = in_ref[...].astype(jnp.float32)
    o = other_ref[...].astype(jnp.float32)
    out_ref[...] = (o - lbda * x).astype(out_ref.dtype)


# --------------------------------------------------------------------------- #
# Wrapper
# --------------------------------------------------------------------------- #
def damping_layer(input_term, other_term, lbda, *, train_lbda=1,
                  block_budget_bytes=None, tile_n=None, tile_f=None):
    """Pallas implementation of Damping_layer.forward.

    input_term, other_term : (N, F) arrays
    lbda                   : (N,) per-node damping when train_lbda == 1,
                             scalar (python float or traced 0-d) when train_lbda == 0
    """
    N, F = input_term.shape
    assert other_term.shape == (N, F)
    dtype = input_term.dtype
    itemsize = jnp.dtype(dtype).itemsize
    out_shape_orig = (N, F)

    # ---- generation-aware VMEM budgeting ------------------------------------
    vmem_cap = _tpu_vmem_capacity_bytes()
    vmem_cap_limit = (vmem_cap * 4) // 5            # never request > 80% of physical
    if block_budget_bytes is None:
        block_budget_bytes = int(0.45 * vmem_cap)   # ~58 MiB v5e/v6e, ~29 MiB v7x
    block_budget_bytes = max(4 * _MIB,
                             min(block_budget_bytes, vmem_cap_limit - 8 * _MIB))
    # Heuristic: 64 MiB-per-core parts (v7x) have 2 TensorCores per chip.
    num_cores = 2 if vmem_cap <= 64 * _MIB else 1

    # ---- pick kernel flavour & operands --------------------------------------
    scalar_const = None
    if train_lbda == 1:
        # Keep lbda in f32 (matches the fp32 Parameter + fp32 matmul accumulate).
        lbda_arg = jnp.asarray(lbda, dtype=jnp.float32).reshape(N, 1)
    else:
        try:
            scalar_const = float(lbda)              # concrete python / numpy scalar
        except Exception:
            scalar_const = None                     # traced under jit -> SMEM scalar
        # Scalar damping is layout-agnostic: present a lane-dense 2-D slab when
        # F is not a multiple of 128 (avoids masked vst.msk partial stores).
        ld = _lane_dense_shape(N, F)
        if ld is not None:
            input_term = input_term.reshape(ld)
            other_term = other_term.reshape(ld)
            N, F = ld

    auto_n, auto_f = _choose_tiles(N, F, itemsize, block_budget_bytes, num_cores)
    tile_n = auto_n if tile_n is None else min(tile_n, N)
    tile_f = auto_f if tile_f is None else min(tile_f, F)

    gi, gj = _cdiv(N, tile_n), _cdiv(F, tile_f)
    one_f_block = (gj == 1)

    if one_f_block:
        grid = (gi,)
        data_spec = pl.BlockSpec((tile_n, tile_f), lambda i: (i, 0))
        dims = ("parallel",)
    else:
        grid = (gi, gj)                              # feature axis innermost
        data_spec = pl.BlockSpec((tile_n, tile_f), lambda i, j: (i, j))
        dims = ("parallel", "parallel")
    out_spec = data_spec

    vmem_limit = min(max(32 * _MIB, block_budget_bytes + 8 * _MIB), vmem_cap_limit)
    compiler_params = pltpu.CompilerParams(
        dimension_semantics=dims,
        vmem_limit_bytes=vmem_limit,
    )
    cost = pl.CostEstimate(
        flops=2 * N * F,
        transcendentals=0,
        bytes_accessed=3 * N * F * itemsize + N * 4,
    )

    if train_lbda == 1:
        # Per-node damping: lane-narrow (tile_n, 1) block whose index only
        # depends on the row axis -> resident across the inner feature axis.
        if one_f_block:
            lbda_spec = pl.BlockSpec((tile_n, 1), lambda i: (i, 0))
        else:
            lbda_spec = pl.BlockSpec((tile_n, 1), lambda i, j: (i, 0))
        kernel = _damping_vec_kernel
        in_specs = [lbda_spec, data_spec, data_spec]
        args = (lbda_arg, input_term, other_term)
    elif scalar_const is not None:
        # Compile-time constant: no lbda operand at all.
        kernel = functools.partial(_damping_const_kernel, scalar_const)
        in_specs = [data_spec, data_spec]
        args = (input_term, other_term)
    else:
        # Traced scalar under jit: pass as a single f32 SMEM scalar.
        lbda_arg = jnp.asarray(lbda, dtype=jnp.float32).reshape(1, 1)
        lbda_spec = pl.BlockSpec(memory_space=pltpu.MemorySpace.SMEM)
        kernel = _damping_smem_kernel
        in_specs = [lbda_spec, data_spec, data_spec]
        args = (lbda_arg, input_term, other_term)

    out = pl.pallas_call(
        kernel,
        out_shape=jax.ShapeDtypeStruct((N, F), dtype),
        grid_spec=pltpu.PrefetchScalarGridSpec(
            num_scalar_prefetch=0,
            grid=grid,
            in_specs=in_specs,
            out_specs=out_spec,
        ),
        compiler_params=compiler_params,
        cost_estimate=cost,
    )(*args)
    return out.reshape(out_shape_orig)


if __name__ == "__main__":
    # Small deterministic example consistent with the module:
    #   n_nodes = 16, n_features = 128.
    n_nodes, n_features = 16, 128

    key = jax.random.PRNGKey(0)
    k1, k2, k3 = jax.random.split(key, 3)
    input_term = jax.random.normal(k1, (n_nodes, n_features), dtype=jnp.float32)
    other_term = jax.random.normal(k2, (n_nodes, n_features), dtype=jnp.float32)

    # --- train_lbda == 1: per-node (trainable diagonal) damping --------------
    lbda_vec = 0.5 + 0.1 * jax.random.normal(k3, (n_nodes,), dtype=jnp.float32)
    out_vec = jax.block_until_ready(
        damping_layer(input_term, other_term, lbda_vec, train_lbda=1))
    # Pure-JAX reference of the literal PyTorch computation: -(X^T @ diag(l)).T + other
    ref_vec = -(input_term.T @ jnp.diag(lbda_vec)).T + other_term
    assert out_vec.shape == (n_nodes, n_features)
    assert jnp.allclose(out_vec, ref_vec, atol=1e-5, rtol=1e-5), "vector-lbda mismatch"

    # --- train_lbda == 0: constant scalar damping (compile-time constant) ----
    init_lbda = 0.5
    out_sc = jax.block_until_ready(
        damping_layer(input_term, other_term, init_lbda, train_lbda=0))
    ref_sc = other_term - init_lbda * input_term
    assert out_sc.shape == (n_nodes, n_features)
    assert jnp.allclose(out_sc, ref_sc, atol=1e-5, rtol=1e-5), "scalar-lbda mismatch"

    # --- train_lbda == 0, F not a multiple of 128 -> lane-dense reshape path --
    f_odd = 96
    x2 = jax.random.normal(k1, (n_nodes, f_odd), dtype=jnp.float32)
    o2 = jax.random.normal(k2, (n_nodes, f_odd), dtype=jnp.float32)
    out2 = jax.block_until_ready(damping_layer(x2, o2, 0.3, train_lbda=0))
    assert jnp.allclose(out2, o2 - 0.3 * x2, atol=1e-5, rtol=1e-5), "lane-dense mismatch"

    # --- train_lbda == 0 with a traced lbda under jit -> SMEM-scalar fallback --
    jitted = jax.jit(functools.partial(damping_layer, train_lbda=0))
    out_jit = jax.block_until_ready(jitted(input_term, other_term, jnp.float32(0.7)))
    assert jnp.allclose(out_jit, other_term - jnp.float32(0.7) * input_term,
                        atol=1e-5, rtol=1e-5), "traced-scalar mismatch"

    # TODO(synk): the PyTorch module also stashes `self.lbda_out` as a side
    # effect; stateless JAX has no equivalent (the value is just the input lbda).
    print("KERNEL_OK")
</pallas_src>

<mosaic_0001>
module attributes {stable_mosaic.version = 11 : i64} {
  func.func @_damping_vec_kernel(%arg0: i32, %arg1: memref<8x1xf32, #tpu.memory_space<vmem>>, %arg2: memref<8x128xf32, #tpu.memory_space<vmem>>, %arg3: memref<8x128xf32, #tpu.memory_space<vmem>>, %arg4: memref<8x128xf32, #tpu.memory_space<vmem>>) attributes {dimension_semantics = [#tpu.dimension_semantics<parallel>], iteration_bounds = array<i64: 2>, scalar_prefetch = 0 : i64, scratch_operands = 0 : i64, tpu.core_type = #tpu.core_type<tc>, window_params = [{transform_indices = @transform_0, window_bounds = array<i64: 8, 1>}, {transform_indices = @transform_1, window_bounds = array<i64: 8, 128>}, {transform_indices = @transform_2, window_bounds = array<i64: 8, 128>}, {transform_indices = @transform_3, window_bounds = array<i64: 8, 128>}]} {
    %c0 = arith.constant 0 : index
    %c0_0 = arith.constant 0 : index
    %0 = vector.load %arg2[%c0, %c0_0] : memref<8x128xf32, #tpu.memory_space<vmem>>, vector<8x128xf32>
    %c0_1 = arith.constant 0 : index
    %c0_2 = arith.constant 0 : index
    %1 = vector.load %arg3[%c0_1, %c0_2] : memref<8x128xf32, #tpu.memory_space<vmem>>, vector<8x128xf32>
    %c0_3 = arith.constant 0 : index
    %c0_4 = arith.constant 0 : index
    %2 = vector.load %arg1[%c0_3, %c0_4] : memref<8x1xf32, #tpu.memory_space<vmem>>, vector<8x1xf32>
    %3 = vector.broadcast %2 : vector<8x1xf32> to vector<8x128xf32>
    %4 = arith.mulf %3, %0 : vector<8x128xf32>
    %5 = arith.subf %1, %4 : vector<8x128xf32>
    %c0_5 = arith.constant 0 : index
    %c0_6 = arith.constant 0 : index
    %6 = vector.load %arg4[%c0_5, %c0_6] : memref<8x128xf32, #tpu.memory_space<vmem>>, vector<8x128xf32>
    tpu.vector_store %arg4[%c0_5, %c0_6], %5 {strides = array<i32>} : memref<8x128xf32, #tpu.memory_space<vmem>>, vector<8x128xf32>,
    return
  }
  func.func @transform_0(%arg0: i32) -> (i32, i32) {
    %c0_i32 = arith.constant 0 : i32
    %c0_i32_0 = arith.constant 0 : i32
    return %arg0, %c0_i32 : i32, i32
  }
  func.func @transform_1(%arg0: i32) -> (i32, i32) {
    %c0_i32 = arith.constant 0 : i32
    %c0_i32_0 = arith.constant 0 : i32
    return %arg0, %c0_i32 : i32, i32
  }
  func.func @transform_2(%arg0: i32) -> (i32, i32) {
    %c0_i32 = arith.constant 0 : i32
    %c0_i32_0 = arith.constant 0 : i32
    return %arg0, %c0_i32 : i32, i32
  }
  func.func @transform_3(%arg0: i32) -> (i32, i32) {
    %c0_i32 = arith.constant 0 : i32
    %c0_i32_0 = arith.constant 0 : i32
    return %arg0, %c0_i32 : i32, i32
  }
}

</mosaic_0001>

<bundles_post_ra>
// kernel: tpu_custom_call.1
= control target key start
LH: loop header
LB: loop body
LE: loop exit
PB: predicated region body
PF: predicated region fallthrough
CT: control target
= control target key end

     0   :  { %8 = vsyncpa [#allocation3], 0  ;;  %s667_s0 = inlined_call_operand.vmem [shape: f32[16,1], index: 0, kind: input, shape index: {}]   ;;  %s668_s1 = inlined_call_operand.vmem [shape: f32[16,128], index: 1, kind: input, shape index: {}]   ;;  %s669_s2 = inlined_call_operand.hbm [shape: f32[16,128], index: 2, kind: input, shape index: {}]   ;;  %s670_s3 = inlined_call_operand.hbm [shape: f32[16,128], index: 3, kind: output, shape index: {}]  }
   0x1   :  { %10 = vsyncpa [#allocation3 + $0x1], 0 }
   0x2   :  { %11 = vsyncpa [#allocation4], 0 }
   0x3   :  { %13 = vsyncpa [#allocation4 + $0x1], 0  ;;  %s518_s12 = smov 0   ;;  %s520_s13 = smov 0  }
   0x4   :  { %s522_s14 = smov 0   ;;  %s524_s15 = smov 0  }
   0x5 LB: > { %s539_s16 = sadd.s32 4294967295, %s493_s15   ;;  %s339_s17 = sadd.s32 4294967294, %s493_s15   ;;  %s493_s15 = sphi %s524_s15, %s687_s15   ;;  %s489_s14 = sphi %s522_s14, %s686_s14   ;;  %s485_s13 = sphi %s520_s13, %s685_s13   ;;  %s481_s12 = sphi %s518_s12, %s684_s12  }
   0x6   : > { %s543_s18 = sadd.s32 1, %s493_s15   ;;  %s78_s19 = sadd.s32 1, %s489_s14 }
   0x7   : > { %s75_s20 = ssub.s32 %s493_s15, %s543_s18  ;;  %p85_p0 = scmp.ne.s32.totalorder %s489_s14, %s485_s13 }
   0x8   : > { %p76_p1 = scmp.eq.s32.totalorder %s75_s20, 0  ;;  %p86_p2 = scmp.eq.s32.totalorder %s493_s15, 0 }
   0x9   : > { %p91_p3 = scmp.ne.s32.totalorder %s485_s13, %s481_s12  ;;  %p92_p4 = scmp.eq.s32.totalorder %s539_s16, 0 }
   0xa   : > { %s555_s21 = scalar_select %p76_p1, %s489_s14, %s78_s19  }
   0xb   : > { %p557_p5 = por %p86_p2, %p85_p0  ;;  %p561_p6 = por %p92_p4, %p91_p3 }
   0xc   : > { %p115_p7 = scmp.eq.s32.totalorder %s539_s16, 1  ;;  %p121_p8 = scmp.eq.s32.totalorder %s339_s17, 1 }
   0xd   : > { %s674_s23 = scalar_select %p561_p6, 1, 0 }
   0xe   : > { %p365_p10 = scmp.lt.s32.totalorder %s493_s15, 2  ;;  %p568_p11 = por %p115_p7, %p85_p0 }
   0xf   : > { %p572_p12 = por %p121_p8, %p91_p3  ;;  %s155_s26 = sand.u32 1, %s489_s14  }
  0x10   : > { %s675_s24 = scalar_select %p568_p11, 1, 0 }
  0x11   : > { %s676_s25 = scalar_select %p572_p12, 1, 0 }
  0x12   : > { %s343_s27 = sshll.u32 %s493_s15, 7  ;;  %s342_s28 = sshll.u32 %s155_s26, 3 }
  0x13   : > { %s581_s4 = scalar_lea.hbm %s669_s2, %s343_s27  ;;  %s159_s5 = scalar_lea.vmem [#allocation2], %s342_s28 }
  0x14   : > { %s166_s6 = sshll.u32 %s159_s5, 4  ;;  %p585_p13 = pnand %p365_p10, %p557_p5  ;;  %s589_s6 = int_to_ptr.vmem [resolvable:$true] %s166_s6 }
  0x15   : > { %s156_s8 = scalar_lea.sflag [#allocation3], %s155_s26  ;;  %s401_s9 = scalar_lea.hbm %s581_s4, 128 }
  0x16   : > { %p402_p2 = scmp.ne.s32.totalorder %s581_s4, %s401_s9  ;;  %p403_p3 = pneg %p585_p13 }
  0x17   : > { %s406_s17 = scalar_lea.hbm %s669_s2, 256  ;;  %p407_p5 = scmp.lt.s32.totalorder %s581_s4, %s669_s2 }
  0x18   : > { %p404_p4 = pnand %p403_p3, %p402_p2  ;;  %p408_p8 = scmp.lt.s32.totalorder %s406_s17, %s401_s9 }
  0x1a   : > { %p405_p7 = pneg %p404_p4  ;;  %p409_p10 = por %p408_p8, %p407_p5 }
  0x1c   : > { %p410_p9 = pnand %p409_p10, %p405_p7 }
  0x1e   : > { %413 = shalt.err (!%p410_p9)
}
  0x1f   : > { %s414_s22 = scalar_lea.vmem %s589_s6, 128  ;;  %s495_s26 = smov [#allocation2]  }
  0x20   : > { %p415_p0 = scmp.ne.s32.totalorder %s589_s6, %s414_s22  ;;  %s419_s27 = sshll.u32 %s495_s26, 4  ;;  %s420_s27 = int_to_ptr.vmem [resolvable:$false] %s419_s27 }
  0x21   : > { %s421_s28 = scalar_lea.vmem %s420_s27, 256  ;;  %p422_p4 = scmp.lt.s32.totalorder %s589_s6, %s420_s27 }
  0x22   : > { %p417_p1 = pnand %p415_p0, %p403_p3  ;;  %p423_p12 = scmp.lt.s32.totalorder %s421_s28, %s414_s22 }
  0x24   : > { %p418_p2 = pneg %p417_p1  ;;  %p424_p11 = por %p423_p12, %p422_p4 }
  0x26   : > { %p425_p6 = pnand %p424_p11, %p418_p2 }
  0x28   : > { %428 = shalt.err (!%p425_p6)
}
  0x29   : > { %360 = dma.hbm_to_vmem [thread:$0]  (!%p585_p13), %s581_s4, 128, %s589_s6, %s156_s8  }
  0x2a   : > { %p678_p9 = scmp.lt.s32.totalorder %s493_s15, 3  ;;  %p679_p7 = scmp.ge.s32.totalorder %s493_s15, 1 }
  0x2c   : > { %p172_p0 = pnand %p679_p7, %p678_p9 }
  0x2d   : > { %s616_s29 = sand.u32 (!%p172_p0), 1, %s485_s13   ;;  %p680_p6 = scmp.ne.s32.totalorder (!%p172_p0), %s674_s23, 0 }
  0x2e   : > { %175 = sbr.rel (%p172_p0) target bundleno = 200 (0xc8), region = 32  ;;  %s345_s30 = sshll.u32 (!%p172_p0), %s616_s29, 3 }
  0x2f   : > { %s178_s5 = scalar_lea.sflag (!%p172_p0), [#allocation3], %s616_s29  ;;  %s181_s9 = scalar_lea.vmem (!%p172_p0), [#allocation2], %s345_s30 }
  0x33   : > { %472 = dma.done.wait (%p680_p6), %s178_s5, 128  }
  0x34   : > { %474 = vsyncadd (%p680_p6), %s178_s5, 4294967168  ;;  %p212_p11 = scmp.lt.s32.totalorder %s539_s16, 1  ;;  %v496_v0 = vmov 0   ;;  %v221_v4 = vld [vmem:[%s181_s9] sm:$0xff]  ;;  %s350_s19 = sshll.u32 %s539_s16, 7 }
  0x35   : > { %400 = vset.pattern.permute.xlu0 %v496_v0  ;;  %s211_s20 = scalar_lea.vmem [#allocation5], %s345_s30  ;;  %s243_s28 = scalar_lea.hbm %s670_s3, %s350_s19 }
  0x36   : > { %s213_s4 = scalar_select %p212_p11, %s539_s16, 1 }
  0x37   : > { %s245_s22 = sshll.u32 %s211_s20, 4  ;;  %s232_s5 = scalar_lea.sflag [#allocation4], %s616_s29  ;;  %s246_s22 = int_to_ptr.vmem [resolvable:$true] %s245_s22 }
  0x38   : > { %s347_s6 = sshll.u32 %s213_s4, 3  ;;  %s429_s4 = scalar_lea.vmem %s246_s22, 128 }
  0x39   : > { %s215_s10 = scalar_lea.vmem %s667_s0, %s347_s6  ;;  %s219_s23 = scalar_lea.vmem %s668_s1, %s347_s6 }
  0x3a   : > { %v222_v1 = vld [vmem:[%s215_s10] sm:$0xff]  ;;  %p430_p12 = scmp.ne.s32.totalorder %s246_s22, %s429_s4  ;;  %p681_p13 = scmp.ne.s32.totalorder %s675_s24, 0 }
  0x3b   : > { %225 = vperm.xlu0 %400, %v222_v1   ;;  %v220_v2 = vld [vmem:[%s219_s23] sm:$0xff]  ;;  %s497_s6 = smov [#allocation5]  }
  0x3c   : > { %p431_p1 = pnand %p430_p12, %p681_p13  ;;  %s433_s7 = sshll.u32 %s497_s6, 4  ;;  %s434_s7 = int_to_ptr.vmem [resolvable:$false] %s433_s7 }
  0x3d   : > { %s435_s16 = scalar_lea.vmem %s434_s7, 256  ;;  %p436_p5 = scmp.lt.s32.totalorder %s246_s22, %s434_s7 }
  0x3e   : > { %p432_p3 = pneg %p431_p1  ;;  %p437_p8 = scmp.lt.s32.totalorder %s435_s16, %s429_s4 }
  0x40   : > { %p438_p10 = por %p437_p8, %p436_p5 }
  0x42   : > { %p439_p2 = pnand %p438_p10, %p432_p3 }
  0xb6   : > { %v226_v3 = vpop.permute.xlu0 %225 }
  0xb7   : > { %v228_v5 = vmul.f32 %v226_v3, %v220_v2 }
  0xb9   : > { %v229_v6 = vsub.f32 %v221_v4, %v228_v5 }
  0xbb   : > { %230 = vst [vmem:[%s211_s20] sm:$0xff] %v229_v6 }
  0xbc   : > { %442 = shalt.err (!%p439_p2)
}
  0xbd   : > { %s443_s30 = scalar_lea.hbm %s243_s28, 128  ;;  %s447_s8 = scalar_lea.hbm %s670_s3, 256 }
  0xbe   : > { %p444_p4 = scmp.ne.s32.totalorder %s243_s28, %s443_s30  ;;  %p448_p0 = scmp.lt.s32.totalorder %s243_s28, %s670_s3 }
  0xbf   : > { %p449_p6 = scmp.lt.s32.totalorder %s447_s8, %s443_s30 }
  0xc0   : > { %p445_p9 = pnand %p444_p4, %p681_p13 }
  0xc1   : > { %p450_p11 = por %p449_p6, %p448_p0 }
  0xc2   : > { %p446_p7 = pneg %p445_p9 }
  0xc4   : > { %p451_p12 = pnand %p450_p11, %p446_p7 }
  0xc6   : > { %454 = shalt.err (!%p451_p12)
}
  0xc7   : > { %355 = dma.vmem_to_hbm [thread:$0]  (%p681_p13), %s246_s22, 128, %s243_s28, %s232_s5  }
  0xc8 PF: > { %s257_s17 = sand.u32 1, %s481_s12   ;;  %p682_p1 = scmp.ne.s32.totalorder %s676_s25, 0 }
  0xc9   : > { %p683_p3 = scmp.ge.s32.totalorder %s493_s15, 2  ;;  %s258_s23 = scalar_lea.sflag [#allocation4], %s257_s17 }
  0xcb   : > { %p362_p5 = pnand %p683_p3, %p682_p1 }
  0xcd   : > { %p363_p8 = pneg %p362_p5 }
  0xcf   : > { %476 = dma.done.wait (%p363_p8), %s258_s23, 128  }
  0xd0   : > { %478 = vsyncadd (%p363_p8), %s258_s23, 4294967168  ;;  %p16_p10 = scmp.ge.s32.totalorder %s543_s18, 4   ;;  %s684_s12 = smov %s485_s13 }
  0xd1   : > { %s685_s13 = smov %s489_s14  ;;  %s686_s14 = smov %s555_s21 }
  0xd2   : > { %s687_s15 = smov %s543_s18  ;;  %18 = sbr.rel (!%p16_p10) target bundleno = 5 (0x5), region = 83 }
  0xd7   :  { %263 = vsyncpa [#allocation3], 1 }
  0xd8   :  { %265 = vsyncpa [#allocation3 + $0x1], 1 }
  0xd9   :  { %266 = vsyncpa [#allocation4], 1 }
  0xda   :  { %268 = vsyncpa [#allocation4 + $0x1], 1 }

</bundles_post_ra>
